<compile_context>
chip_gen: v7x
topology: tpu7x:2x2x1
jax: 0.10.0
libtpu: 0.0.40
codegen_flags: <defaults>
</compile_context>

<pallas_src>
import jax
import jax.numpy as jnp
from jax.experimental import pallas as pl
from jax.experimental.pallas import tpu as pltpu


def _make_final_combine_kernel(entries):
    """entries: list of ("copy", C_i) or ("fr", channels) in output-channel order."""

    def kernel(*refs):
        o_ref = refs[-1]
        in_refs = refs[:-1]
        r = 0
        pieces = []
        for kind, _c in entries:
            if kind == "copy":
                x_ref = in_refs[r]
                r += 1
                pieces.append(x_ref[0])                       # (C_i, thw), already out dtype
            else:  # factorized reduce: one fused block-diagonal (conv1x1+BN) matmul
                p_ref, w_ref, b_ref = in_refs[r:r + 3]
                r += 3
                y = jnp.dot(w_ref[...], p_ref[0].astype(jnp.float32),
                            preferred_element_type=jnp.float32)
                y = y + b_ref[...]                            # (channels, thw)
                pieces.append(y.astype(o_ref.dtype))
        # Assemble the whole output tile in registers; single lane-dense store.
        slab = pieces[0] if len(pieces) == 1 else jnp.concatenate(pieces, axis=0)
        o_ref[...] = slab[None]

    return kernel


def final_combine(states, concat, out_hw, channels, fr_params, *, hw_tile=512):
    """Pallas FinalCombine.

    states    : list of NCHW arrays.
    concat    : indices of states to concatenate (channel dim).
    fr_params : {state_idx: dict(w1, w2, gamma, beta, mean, var, eps)} for
                states that need FactorizedReduce (spatial size == 2*out_hw).
                w1, w2 are (C_half, C_in) 1x1-conv weights (PyTorch layout).
    Returns (N, sum_C, out_hw, out_hw) in NCHW.
    """
    first = states[concat[0]]
    N = first.shape[0]
    dtype = first.dtype
    HW = out_hw * out_hw

    # Spatial (lane) tile: full extent if small, otherwise a multiple of 128
    # (ragged last tile is masked by Pallas -- no data padding / slicing).
    if HW <= hw_tile:
        thw = HW
    else:
        thw = max(128, (hw_tile // 128) * 128)
    n_hw = pl.cdiv(HW, thw)
    grid = (N, n_hw)

    def _pad(a, m):
        return ((a + m - 1) // m) * m

    inputs, in_specs, entries = [], [], []
    total_C = 0
    vmem_elems = 0  # padded per-buffer element estimate for the VMEM limit

    for i in concat:
        x = states[i]
        n, c_in, h, w = x.shape
        assert n == N
        if i in fr_params:
            assert h == 2 * out_hw and w == 2 * out_hw
            p = fr_params[i]
            w1, w2 = p["w1"], p["w2"]                          # (C_half, C_in)
            c_half = w1.shape[0]
            assert 2 * c_half == channels
            scale = (p["gamma"] / jnp.sqrt(p["var"] + p["eps"])).astype(jnp.float32)
            bias = (p["beta"] - p["mean"] * scale).astype(jnp.float32)
            # Fold BN into the conv and fuse both FR paths into ONE
            # block-diagonal weight:  Y = W_blk @ [p1 ; p2] + bias.
            w1s = w1.astype(jnp.float32) * scale[:c_half, None]
            w2s = w2.astype(jnp.float32) * scale[c_half:, None]
            w_blk = jnp.zeros((channels, 2 * c_in), jnp.float32)
            w_blk = w_blk.at[:c_half, :c_in].set(w1s)
            w_blk = w_blk.at[c_half:, c_in:].set(w2s)
            b_col = bias[:, None]                              # (channels, 1)

            # Single fused gather producing the stacked [p1 ; p2] operand,
            # channel-major with flattened spatial on the lane axis.
            p1 = x[:, :, 0::2, 0::2].reshape(N, c_in, HW)
            p2 = x[:, :, 1::2, 1::2].reshape(N, c_in, HW)
            p12 = jnp.concatenate([p1, p2], axis=1)            # (N, 2*C_in, HW)

            inputs += [p12, w_blk, b_col]
            in_specs += [
                pl.BlockSpec((1, 2 * c_in, thw), lambda nn, tt: (nn, 0, tt)),
                pl.BlockSpec((channels, 2 * c_in), lambda nn, tt: (0, 0)),
                pl.BlockSpec((channels, 1), lambda nn, tt: (0, 0)),
            ]
            entries.append(("fr", channels))
            total_C += channels
            vmem_elems += _pad(2 * c_in, 8) * _pad(thw, 128)
            vmem_elems += _pad(channels, 8) * (_pad(2 * c_in, 128) + 128)
        else:
            assert h == out_hw and w == out_hw
            # Free metadata reshape (contiguous dim merge) -- no HBM pass.
            x_flat = x.reshape(N, c_in, HW)
            inputs.append(x_flat)
            in_specs.append(pl.BlockSpec((1, c_in, thw), lambda nn, tt: (nn, 0, tt)))
            entries.append(("copy", c_in))
            total_C += c_in
            vmem_elems += _pad(c_in, 8) * _pad(thw, 128)

    vmem_elems += _pad(total_C, 8) * _pad(thw, 128)            # output tile

    # Double-buffered padded tiles + headroom, capped under v7x's 64 MiB VMEM.
    vmem_limit = int(min(64 * 1024 * 1024,
                         max(16 * 1024 * 1024,
                             2 * vmem_elems * 4 + 4 * 1024 * 1024)))

    kernel = _make_final_combine_kernel(entries)

    out3d = pl.pallas_call(
        kernel,
        out_shape=jax.ShapeDtypeStruct((N, total_C, HW), dtype),
        grid_spec=pltpu.PrefetchScalarGridSpec(
            num_scalar_prefetch=0,
            grid=grid,
            in_specs=in_specs,
            out_specs=pl.BlockSpec((1, total_C, thw), lambda nn, tt: (nn, 0, tt)),
        ),
        compiler_params=pltpu.CompilerParams(
            dimension_semantics=("parallel", "parallel"),
            vmem_limit_bytes=vmem_limit,
        ),
    )(*inputs)

    # Free metadata reshape (contiguous dim split) back to NCHW.
    return out3d.reshape(N, total_C, out_hw, out_hw)


# ----------------------------- pure-JAX reference -----------------------------
def _factorized_reduce_ref(x, w1, w2, gamma, beta, mean, var, eps):
    p1 = x[:, :, 0::2, 0::2]
    xp = jnp.pad(x, ((0, 0), (0, 0), (0, 1), (0, 1)))[:, :, 1:, 1:]
    p2 = xp[:, :, 0::2, 0::2]
    y1 = jnp.einsum("nchw,oc->nohw", p1, w1, precision="highest")
    y2 = jnp.einsum("nchw,oc->nohw", p2, w2, precision="highest")
    y = jnp.concatenate([y1, y2], axis=1)
    scale = gamma / jnp.sqrt(var + eps)
    bias = beta - mean * scale
    return y * scale[None, :, None, None] + bias[None, :, None, None]


def final_combine_ref(states, concat, fr_params):
    outs = []
    for i in concat:
        if i in fr_params:
            p = fr_params[i]
            outs.append(_factorized_reduce_ref(states[i], p["w1"], p["w2"],
                                               p["gamma"], p["beta"],
                                               p["mean"], p["var"], p["eps"]))
        else:
            outs.append(states[i])
    return jnp.concatenate(outs, axis=1)


if __name__ == "__main__":
    key = jax.random.PRNGKey(0)
    ks = jax.random.split(key, 9)

    # Config: state 0 is at 2x resolution -> FactorizedReduce to `channels`;
    # states 1 and 2 are already at out_hw and are concatenated as-is.
    N = 2
    out_hw = 8
    channels = 8
    c_in0 = 4
    concat = [0, 1, 2]

    states = [
        jax.random.normal(ks[0], (N, c_in0, 2 * out_hw, 2 * out_hw), jnp.float32),
        jax.random.normal(ks[1], (N, channels, out_hw, out_hw), jnp.float32),
        jax.random.normal(ks[2], (N, channels, out_hw, out_hw), jnp.float32),
    ]

    c_half = channels // 2
    fr_params = {
        0: dict(
            w1=jax.random.normal(ks[3], (c_half, c_in0), jnp.float32) * 0.5,
            w2=jax.random.normal(ks[4], (c_half, c_in0), jnp.float32) * 0.5,
            gamma=1.0 + 0.1 * jax.random.normal(ks[5], (channels,), jnp.float32),
            beta=0.1 * jax.random.normal(ks[6], (channels,), jnp.float32),
            mean=0.1 * jax.random.normal(ks[7], (channels,), jnp.float32),
            var=jax.nn.softplus(jax.random.normal(ks[8], (channels,), jnp.float32)) + 0.5,
            eps=1e-5,
        )
    }

    out = final_combine(states, concat, out_hw, channels, fr_params)
    jax.block_until_ready(out)

    ref = final_combine_ref(states, concat, fr_params)

    assert out.shape == (N, 3 * channels, out_hw, out_hw), out.shape
    assert out.dtype == states[0].dtype, out.dtype
    max_err = float(jnp.max(jnp.abs(out - ref)))
    assert jnp.allclose(out, ref, rtol=1e-3, atol=1e-3), f"max abs err = {max_err}"

    print("KERNEL_OK")
</pallas_src>

<mosaic_0001>
module attributes {stable_mosaic.version = 11 : i64} {
  func.func @kernel(%arg0: i32, %arg1: i32, %arg2: memref<1x8x64xf32, #tpu.memory_space<vmem>>, %arg3: memref<8x8xf32, #tpu.memory_space<vmem>>, %arg4: memref<8x1xf32, #tpu.memory_space<vmem>>, %arg5: memref<1x8x64xf32, #tpu.memory_space<vmem>>, %arg6: memref<1x8x64xf32, #tpu.memory_space<vmem>>, %arg7: memref<1x24x64xf32, #tpu.memory_space<vmem>>) attributes {dimension_semantics = [#tpu.dimension_semantics<parallel>, #tpu.dimension_semantics<parallel>], iteration_bounds = array<i64: 2, 1>, scalar_prefetch = 0 : i64, scratch_operands = 0 : i64, tpu.core_type = #tpu.core_type<tc>, window_params = [{transform_indices = @transform_0, window_bounds = array<i64: 1, 8, 64>}, {pipeline_mode = #tpu.pipeline_mode<synchronous>, transform_indices = @transform_1, window_bounds = array<i64: 8, 8>}, {pipeline_mode = #tpu.pipeline_mode<synchronous>, transform_indices = @transform_2, window_bounds = array<i64: 8, 1>}, {transform_indices = @transform_3, window_bounds = array<i64: 1, 8, 64>}, {transform_indices = @transform_4, window_bounds = array<i64: 1, 8, 64>}, {transform_indices = @transform_5, window_bounds = array<i64: 1, 24, 64>}]} {
    %c0 = arith.constant 0 : index
    %c0_0 = arith.constant 0 : index
    %0 = vector.load %arg3[%c0, %c0_0] : memref<8x8xf32, #tpu.memory_space<vmem>>, vector<8x8xf32>
    %c0_1 = arith.constant 0 : index
    %c0_2 = arith.constant 0 : index
    %c0_3 = arith.constant 0 : index
    %1 = vector.load %arg2[%c0_1, %c0_2, %c0_3] : memref<1x8x64xf32, #tpu.memory_space<vmem>>, vector<1x8x64xf32>
    %2 = vector.shape_cast %1 : vector<1x8x64xf32> to vector<8x64xf32>
    %cst = arith.constant dense<0.000000e+00> : vector<8x64xf32>
    %3 = tpu.matmul %0, %2, %cst {dimension_numbers = #tpu.dot_dimension_numbers<[1], [0], [0], [1], [0, 0, 1, 1], [], []>} : vector<8x8xf32>, vector<8x64xf32>, vector<8x64xf32> -> vector<8x64xf32>
    %c0_4 = arith.constant 0 : index
    %c0_5 = arith.constant 0 : index
    %4 = vector.load %arg4[%c0_4, %c0_5] : memref<8x1xf32, #tpu.memory_space<vmem>>, vector<8x1xf32>
    %5 = vector.broadcast %4 : vector<8x1xf32> to vector<8x64xf32>
    %6 = arith.addf %3, %5 : vector<8x64xf32>
    %c0_6 = arith.constant 0 : index
    %c0_7 = arith.constant 0 : index
    %c0_8 = arith.constant 0 : index
    %7 = vector.load %arg5[%c0_6, %c0_7, %c0_8] : memref<1x8x64xf32, #tpu.memory_space<vmem>>, vector<1x8x64xf32>
    %8 = vector.shape_cast %7 : vector<1x8x64xf32> to vector<8x64xf32>
    %c0_9 = arith.constant 0 : index
    %c0_10 = arith.constant 0 : index
    %c0_11 = arith.constant 0 : index
    %9 = vector.load %arg6[%c0_9, %c0_10, %c0_11] : memref<1x8x64xf32, #tpu.memory_space<vmem>>, vector<1x8x64xf32>
    %10 = vector.shape_cast %9 : vector<1x8x64xf32> to vector<8x64xf32>
    %11 = tpu.concatenate %6, %8, %10 in 0 : vector<8x64xf32>, vector<8x64xf32>, vector<8x64xf32> -> vector<24x64xf32>
    %12 = vector.shape_cast %11 : vector<24x64xf32> to vector<1x24x64xf32>
    %c0_12 = arith.constant 0 : index
    %c0_13 = arith.constant 0 : index
    %c0_14 = arith.constant 0 : index
    %13 = vector.load %arg7[%c0_12, %c0_13, %c0_14] : memref<1x24x64xf32, #tpu.memory_space<vmem>>, vector<1x24x64xf32>
    tpu.vector_store %arg7[%c0_12, %c0_13, %c0_14], %12 {strides = array<i32>} : memref<1x24x64xf32, #tpu.memory_space<vmem>>, vector<1x24x64xf32>,
    return
  }
  func.func @transform_0(%arg0: i32, %arg1: i32) -> (i32, i32, i32) {
    %c0_i32 = arith.constant 0 : i32
    %c0_i32_0 = arith.constant 0 : i32
    return %arg0, %c0_i32, %arg1 : i32, i32, i32
  }
  func.func @transform_1(%arg0: i32, %arg1: i32) -> (i32, i32) {
    %c0_i32 = arith.constant 0 : i32
    %c0_i32_0 = arith.constant 0 : i32
    %c0_i32_1 = arith.constant 0 : i32
    return %c0_i32, %c0_i32_0 : i32, i32
  }
  func.func @transform_2(%arg0: i32, %arg1: i32) -> (i32, i32) {
    %c0_i32 = arith.constant 0 : i32
    %c0_i32_0 = arith.constant 0 : i32
    %c0_i32_1 = arith.constant 0 : i32
    return %c0_i32, %c0_i32_0 : i32, i32
  }
  func.func @transform_3(%arg0: i32, %arg1: i32) -> (i32, i32, i32) {
    %c0_i32 = arith.constant 0 : i32
    %c0_i32_0 = arith.constant 0 : i32
    return %arg0, %c0_i32, %arg1 : i32, i32, i32
  }
  func.func @transform_4(%arg0: i32, %arg1: i32) -> (i32, i32, i32) {
    %c0_i32 = arith.constant 0 : i32
    %c0_i32_0 = arith.constant 0 : i32
    return %arg0, %c0_i32, %arg1 : i32, i32, i32
  }
  func.func @transform_5(%arg0: i32, %arg1: i32) -> (i32, i32, i32) {
    %c0_i32 = arith.constant 0 : i32
    %c0_i32_0 = arith.constant 0 : i32
    return %arg0, %c0_i32, %arg1 : i32, i32, i32
  }
}

</mosaic_0001>

<bundles_post_ra>
// kernel: tpu_custom_call.1
= control target key start
LH: loop header
LB: loop body
LE: loop exit
PB: predicated region body
PF: predicated region fallthrough
CT: control target
= control target key end

     0   :  { %s1164_s0 = inlined_call_operand.hbm [shape: f32[2,8,64], index: 0, kind: input, shape index: {}]   ;;  %s1165_s1 = inlined_call_operand.hbm [shape: f32[8,8], index: 1, kind: input, shape index: {}]   ;;  %s1166_s2 = inlined_call_operand.vmem [shape: f32[8,1], index: 2, kind: input, shape index: {}]   ;;  %s1167_s3 = inlined_call_operand.vmem [shape: f32[2,8,64], index: 3, kind: input, shape index: {}]   ;;  %s1168_s4 = inlined_call_operand.hbm [shape: f32[2,8,64], index: 4, kind: input, shape index: {}]   ;;  %s1169_s5 = inlined_call_operand.hbm [shape: f32[2,24,64], index: 5, kind: output, shape index: {}]  }
   0x1   :  { %1176 = sst [smem:[#allocation14_spill]] %s1164_s0 }
   0x2   :  { %10 = vsyncpa [#allocation3], 0 }
   0x3   :  { %12 = vsyncpa [#allocation3 + $0x1], 0 }
   0x4   :  { %13 = vsyncpa [#allocation6], 0 }
   0x5   :  { %14 = vsyncpa [#allocation4], 0 }
   0x6   :  { %16 = vsyncpa [#allocation4 + $0x1], 0  ;;  %s898_s18 = smov 0   ;;  %s900_s19 = smov 0  }
   0x7   :  { %s902_s20 = smov 0   ;;  %s904_s21 = smov 0  }
   0x8   :  { %s906_s22 = smov 0   ;;  %s908_s23 = smov 0  }
   0x9 LB: > { %s34_s24 = sadd.s32 1, %s853_s22  ;;  %s43_s25 = sadd.s32 1, %s845_s20  ;;  %s857_s23 = sphi %s908_s23, %s22_s23   ;;  %s853_s22 = sphi %s906_s22, %s1200_s22   ;;  %s849_s21 = sphi %s904_s21, %s1199_s21   ;;  %s845_s20 = sphi %s902_s20, %s1198_s20   ;;  %s841_s19 = sphi %s900_s19, %s1197_s19   ;;  %s837_s18 = sphi %s898_s18, %s1196_s18  }
   0xa   : > { %p36_p0 = scmp.ge.s32.totalorder %s34_s24, 2  ;;  %p50_p1 = scmp.ne.s32.totalorder %s845_s20, %s841_s19 }
   0xb   : > { %p51_p2 = scmp.eq.s32.totalorder %s857_s23, 0  ;;  %p621_p5 = scmp.lt.s32.totalorder %s857_s23, 2 }
   0xc   : > { %s1202_s24 = smov (%p36_p0, %s34_s24), 0  ;;  %s220_s27 = sand.u32 1, %s857_s23  }
   0xd   : > { %1177 = sst [smem:[#allocation13_spill]] %s1202_s24  ;;  %p52_p4 = por %p51_p2, %p50_p1 }
   0xe   : > { %s38_s26 = ssub.s32 %s853_s22, %s1202_s24  ;;  %s222_s28 = sand.u32 1, %s845_s20  }
   0xf   : > { %p41_p6 = scmp.eq.s32.totalorder %s38_s26, 0  ;;  %s574_s29 = sshll.u32 %s853_s22, 7 }
  0x10   : > { %s948_s6 = sshll.u32 %s222_s28, 3  ;;  %s1178_s0 = sld [smem:[#allocation14_spill]] }
  0x11   : > { %s946_s30 = scalar_select %p41_p6, %s845_s20, %s43_s25  }
  0x12   : > { %p957_p7 = pnand %p621_p5, %p52_p4  ;;  %s224_s11 = scalar_lea.vmem [#allocation2], %s948_s6 }
  0x13   : > { %s232_s12 = sshll.u32 %s224_s11, 4  ;;  %s964_s13 = scalar_lea.sflag [#allocation3], %s220_s27  ;;  %s962_s12 = int_to_ptr.vmem [resolvable:$true] %s232_s12 }
  0x14   : > { %p681_p9 = pneg %p957_p7 }
  0x16   : > { %s955_s9 = scalar_lea.hbm %s1178_s0, %s574_s29  ;;  %s684_s17 = scalar_lea.hbm %s1178_s0, 256 }
  0x17   : > { %s679_s14 = scalar_lea.hbm %s955_s9, 128  ;;  %p685_p12 = scmp.lt.u32.totalorder %s955_s9, %s1178_s0 }
  0x18   : > { %p680_p8 = scmp.ne.s32.totalorder %s955_s9, %s679_s14  ;;  %p686_p13 = scmp.lt.u32.totalorder %s684_s17, %s679_s14 }
  0x19   : > { %p688_p2 = scmp.lt.u32.totalorder %s679_s14, %s955_s9 }
  0x1a   : > { %p682_p10 = pnand %p681_p9, %p680_p8  ;;  %p687_p0 = por %p686_p13, %p685_p12 }
  0x1c   : > { %p683_p11 = pneg %p682_p10  ;;  %p689_p4 = por %p688_p2, %p687_p0 }
  0x1e   : > { %p690_p5 = pnand %p689_p4, %p683_p11 }
  0x20   : > { %693 = shalt.err (!%p690_p5)
}
  0x21   : > { %s694_s27 = scalar_lea.vmem %s962_s12, 128  ;;  %s859_s28 = smov [#allocation2]  }
  0x22   : > { %p695_p6 = scmp.ne.s32.totalorder %s962_s12, %s694_s27  ;;  %s699_s7 = sshll.u32 %s859_s28, 4  ;;  %s700_s7 = int_to_ptr.vmem [resolvable:$false] %s699_s7 }
  0x23   : > { %s701_s8 = scalar_lea.vmem %s700_s7, 256  ;;  %p702_p3 = scmp.lt.s32.totalorder %s962_s12, %s700_s7 }
  0x24   : > { %p697_p8 = pnand %p695_p6, %p681_p9  ;;  %p703_p12 = scmp.lt.s32.totalorder %s701_s8, %s694_s27 }
  0x26   : > { %p698_p10 = pneg %p697_p8  ;;  %p704_p13 = por %p703_p12, %p702_p3 }
  0x28   : > { %p705_p0 = pnand %p704_p13, %p698_p10 }
  0x2a   : > { %708 = shalt.err (!%p705_p0)
}
  0x2b   : > { %612 = dma.hbm_to_vmem [thread:$0]  (!%p957_p7), %s955_s9, 128, %s962_s12, %s964_s13  }
  0x2c   : > { %s993_s11 = sadd.s32 4294967295, %s857_s23   ;;  %s569_s14 = sadd.s32 4294967294, %s857_s23  }
  0x2d   : > { %p56_p3 = scmp.ne.s32.totalorder %s841_s19, %s837_s18  ;;  %p1171_p11 = scmp.eq.s32.totalorder %s993_s11, 0 }
  0x2e   : > { %p180_p2 = scmp.eq.s32.totalorder %s993_s11, 1  ;;  %p186_p4 = scmp.eq.s32.totalorder %s569_s14, 1 }
  0x2f   : > { %p570_p5 = scmp.ge.s32.totalorder %s857_s23, 1  ;;  %p1003_p6 = por %p1171_p11, %p56_p3 }
  0x30   : > { %p1010_p8 = por %p180_p2, %p50_p1  ;;  %p1014_p10 = por %p186_p4, %p56_p3 }
  0x31   : > { %s1180_s15 = scalar_select %p1003_p6, 1, 0 }
  0x32   : > { %s1181_s9 = scalar_select %p1010_p8, 1, 0 }
  0x33   : > { %s1182_s12 = scalar_select %p1014_p10, 1, 0 }
  0x34   : > { %p193_p12 = scmp.lt.s32.totalorder %s857_s23, 3  ;;  %s1024_s25 = scalar_lea.hbm %s1168_s4, %s574_s29 }
  0x35   : > { %s860_s27 = smov [#allocation5]   ;;  %s253_s7 = scalar_lea.vmem [#allocation7], %s948_s6 }
  0x36   : > { %p1026_p13 = pnand %p570_p5, %p193_p12  ;;  %s1030_s28 = sshll.u32 %s860_s27, 4  ;;  %s207_s28 = int_to_ptr.vmem [resolvable:$true] %s1030_s28 }
  0x37   : > { %s261_s8 = sshll.u32 %s253_s7, 4  ;;  %s709_s14 = scalar_lea.hbm %s1024_s25, 128  ;;  %s262_s8 = int_to_ptr.vmem [resolvable:$true] %s261_s8 }
  0x38   : > { %s1183_s26 = scalar_select %p1026_p13, 1, 0 }
  0x39   : > { %p710_p0 = scmp.ne.s32.totalorder %s1024_s25, %s709_s14  ;;  %s714_s17 = scalar_lea.hbm %s1168_s4, 256 }
  0x3a   : > { %p715_p4 = scmp.lt.u32.totalorder %s1024_s25, %s1168_s4  ;;  %p716_p5 = scmp.lt.u32.totalorder %s714_s17, %s709_s14 }
  0x3b   : > { %p712_p3 = pnand %p710_p0, %p681_p9  ;;  %p718_p11 = scmp.lt.u32.totalorder %s709_s14, %s1024_s25 }
  0x3c   : > { %p717_p12 = por %p716_p5, %p715_p4 }
  0x3d   : > { %p713_p2 = pneg %p712_p3 }
  0x3e   : > { %p719_p10 = por %p718_p11, %p717_p12 }
  0x40   : > { %p720_p1 = pnand %p719_p10, %p713_p2 }
  0x42   : > { %723 = shalt.err (!%p720_p1)
}
  0x43   : > { %s724_s6 = scalar_lea.vmem %s262_s8, 128  ;;  %s861_s27 = smov [#allocation7]  }
  0x44   : > { %p725_p8 = scmp.ne.s32.totalorder %s262_s8, %s724_s6  ;;  %s729_s7 = sshll.u32 %s861_s27, 4  ;;  %s730_s7 = int_to_ptr.vmem [resolvable:$false] %s729_s7 }
  0x45   : > { %s731_s29 = scalar_lea.vmem %s730_s7, 256  ;;  %p732_p6 = scmp.lt.s32.totalorder %s262_s8, %s730_s7 }
  0x46   : > { %p727_p0 = pnand %p725_p8, %p681_p9  ;;  %p733_p13 = scmp.lt.s32.totalorder %s731_s29, %s724_s6 }
  0x48   : > { %p728_p3 = pneg %p727_p0  ;;  %p734_p4 = por %p733_p13, %p732_p6 }
  0x4a   : > { %p735_p5 = pnand %p734_p4, %p728_p3 }
  0x4c   : > { %738 = shalt.err (!%p735_p5)
}
  0x4d   : > { %615 = dma.hbm_to_vmem [thread:$0]  (!%p957_p7), %s1024_s25, 128, %s262_s8, %s964_s13  }
  0x4e   : > { %p1184_p9 = scmp.eq.s32.totalorder %s993_s11, 0  ;;  %p1185_p11 = scmp.ne.s32.totalorder %s1183_s26, 0 }
  0x4f   : > { %s739_s16 = scalar_lea.hbm %s1165_s1, 128 }
  0x50   : > { %p1186_p8 = pneg %p1185_p11  ;;  %p740_p6 = scmp.ne.s32.totalorder %s1165_s1, %s739_s16 }
  0x51   : > { %p746_p2 = scmp.lt.u32.totalorder %s739_s16, %s1165_s1 }
  0x52   : > { %p1061_p10 = pnand %p1186_p8, %p1184_p9 }
  0x54   : > { %p741_p13 = pneg %p1061_p10 }
  0x56   : > { %p742_p7 = pnand %p741_p13, %p740_p6 }
  0x58   : > { %p743_p1 = pneg %p742_p7 }
  0x5a   : > { %p748_p12 = pnand %p746_p2, %p743_p1 }
  0x5c   : > { %751 = shalt.err (!%p748_p12)
}
  0x5d   : > { %s752_s8 = scalar_lea.vmem %s207_s28, 128  ;;  %p760_p5 = scmp.lt.s32.totalorder %s207_s28, %s207_s28 }
  0x5e   : > { %p753_p0 = scmp.ne.s32.totalorder %s207_s28, %s752_s8  ;;  %p761_p9 = scmp.lt.s32.totalorder %s752_s8, %s752_s8 }
  0x60   : > { %p755_p3 = pnand %p753_p0, %p741_p13  ;;  %p762_p8 = por %p761_p9, %p760_p5 }
  0x62   : > { %p756_p4 = pneg %p755_p3 }
  0x64   : > { %p763_p11 = pnand %p762_p8, %p756_p4 }
  0x66   : > { %766 = shalt.err (!%p763_p11)
}
  0x67   : > { %608 = dma.hbm_to_vmem [thread:$0]  (!%p1061_p10), %s1165_s1, 128, %s207_s28, [#allocation6]  }
  0x68   : > { %p1188_p6 = scmp.ne.s32.totalorder %s1183_s26, 0 }
  0x69   : > { %s272_s7 = sand.u32 (!%p1188_p6), 1, %s993_s11   ;;  %s1085_s29 = sand.u32 (!%p1188_p6), 1, %s841_s19  }
  0x6a   : > { %270 = sbr.rel (%p1188_p6) target bundleno = 352 (0x160), region = 40  ;;  %s578_s24 = sshll.u32 (!%p1188_p6), %s1085_s29, 3 }
  0x6b   : > { %s273_s14 = scalar_lea.sflag (!%p1188_p6), [#allocation3], %s272_s7  ;;  %s276_s16 = scalar_lea.vmem (!%p1188_p6), [#allocation2], %s578_s24 }
  0x6c   : > { %p1189_p11 = scmp.ne.s32.totalorder (!%p1188_p6), %s1180_s15, 0 }
  0x71   : > { %820 = dma.done.wait (%p1189_p11), %s273_s14, 128  }
  0x72   : > { %822 = vsyncadd (%p1189_p11), %s273_s14, 4294967168  ;;  %p1190_p10 = scmp.eq.s32.totalorder %s993_s11, 0 }
  0x74   : > { %824 = dma.done.wait (%p1190_p10), [#allocation6], 128   ;;  %p1191_p13 = pmov %p1190_p10 }
  0x75   : > { %s289_s26 = scalar_lea.vmem [#allocation7], %s578_s24 }
  0x76   : > { %826 = vsyncadd (%p1191_p13), [#allocation6], 4294967168 }
  0x77   : > { %828 = dma.done.wait (%p1189_p11), %s273_s14, 128  }
  0x78   : > { %830 = vsyncadd (%p1189_p11), %s273_s14, 4294967168  ;;  %v862_v0 = vmov 0.0   ;;  %vm863_vm0 = vmmov 0   ;;  %v864_v1 = vmov 0   ;;  %vm343_vm1 = vcmask 64512   ;;  %v336_v2 = vld [vmem:[%s276_s16] sm:$0xff] }
  0x79   : > { %588 = vmatprep.subr.mxu0 %v862_v0  ;;  %590 = vmatprep.mubr.msk.f32.mxu0 %vm863_vm0, %v862_v0  ;;  %v335_v3 = vld [vmem:[#allocation5] sm:$0xff]  ;;  %v337_v4 = vld [vmem:[%s1166_s2] sm:$0xff]  ;;  %p328_p7 = scmp.lt.s32.totalorder %s849_s21, 1  ;;  %s593_s0 = smul.u32 24, %s1085_s29  ;;  %vm419_vm2 = vcmask 523264  }
  0x7a   : > { %678 = vset.pattern.permute.xlu0 %v864_v1  ;;  %589 = vmatpush3.msra.mxu0 %v336_v2  ;;  %v418_v6 = vld [vmem:[%s289_s26] sm:$0xff]  ;;  %s594_s27 = smul.u32 384, %s849_s21  ;;  %s424_s16 = scalar_lea.sflag [#allocation4], %s1085_s29 }
  0x7b   : > { %340 = vperm.xlu0 %678, %v337_v4   ;;  %591 = vmatmul.mubr.msk.f32.vlgmr.msra.gmra.mrb[0].mxu0 %vm343_vm1, %v335_v3  ;;  %s329_s15 = scalar_select %p328_p7, %s849_s21, 1 }
  0x7c   : > { %s327_s8 = scalar_lea.vmem [#allocation8], %s593_s0  ;;  %s1115_s14 = scalar_lea.hbm %s1169_s5, %s594_s27 }
  0x7d   : > { %s581_s10 = sshll.u32 %s329_s15, 3  ;;  %422 = vst.msk [vmem:[%s327_s8 + $0x10] sm:$0xff] %vm419_vm2, %v418_v6  ;;  %s438_s6 = sshll.u32 %s327_s8, 4  ;;  %s1110_s6 = int_to_ptr.vmem [resolvable:$true] %s438_s6 }
  0x7e   : > { %s334_s25 = scalar_lea.vmem %s1167_s3, %s581_s10  ;;  %s767_s26 = scalar_lea.vmem %s1110_s6, 384 }
  0x7f   : > { %v417_v5 = vld [vmem:[%s334_s25] sm:$0xff]  ;;  %p768_p1 = scmp.ne.s32.totalorder %s1110_s6, %s767_s26  ;;  %p1192_p2 = scmp.ne.s32.totalorder %s1181_s9, 0 }
  0x80   : > { %421 = vst.msk [vmem:[%s327_s8 + $0x8] sm:$0xff] %vm419_vm2, %v417_v5  ;;  %s865_s21 = smov [#allocation8]  }
  0x81   : > { %p769_p12 = pnand %p768_p1, %p1192_p2  ;;  %s771_s11 = sshll.u32 %s865_s21, 4  ;;  %s772_s11 = int_to_ptr.vmem [resolvable:$false] %s771_s11 }
  0x82   : > { %s773_s28 = scalar_lea.vmem %s772_s11, 768  ;;  %p774_p3 = scmp.lt.s32.totalorder %s1110_s6, %s772_s11 }
  0x83   : > { %p770_p0 = pneg %p769_p12  ;;  %p775_p4 = scmp.lt.s32.totalorder %s773_s28, %s767_s26 }
  0x85   : > { %p776_p5 = por %p775_p4, %p774_p3 }
  0x87   : > { %p777_p9 = pnand %p776_p5, %p770_p0 }
  0xfa   : > { %v341_v7 = vpop.permute.xlu0 %340 }
 0x14e   : > { %v413_v8 = vpop.f32.mrb[0].mxu0 }
 0x14f   : > { %v414_v9 = vadd.f32 %v413_v8, %v341_v7  ;;  %v592_v10 = vpop.f32.mrb[1].mxu0 }
 0x151   : > { %420 = vst.msk [vmem:[%s327_s8] sm:$0xff] %vm419_vm2, %v414_v9 }
 0x152   : > { %780 = shalt.err (!%p777_p9)
}
 0x153   : > { %s781_s15 = scalar_lea.hbm %s1115_s14, 384  ;;  %s785_s17 = scalar_lea.hbm %s1169_s5, 768 }
 0x154   : > { %p782_p8 = scmp.ne.s32.totalorder %s1115_s14, %s781_s15  ;;  %p786_p10 = scmp.lt.u32.totalorder %s1115_s14, %s1169_s5 }
 0x155   : > { %p787_p13 = scmp.lt.u32.totalorder %s785_s17, %s781_s15  ;;  %p789_p1 = scmp.lt.u32.totalorder %s781_s15, %s1115_s14 }
 0x156   : > { %p783_p6 = pnand %p782_p8, %p1192_p2 }
 0x157   : > { %p788_p7 = por %p787_p13, %p786_p10 }
 0x158   : > { %p784_p11 = pneg %p783_p6 }
 0x159   : > { %p790_p12 = por %p789_p1, %p788_p7 }
 0x15b   : > { %p791_p0 = pnand %p790_p12, %p784_p11 }
 0x15d   : > { %794 = shalt.err (!%p791_p0)
}
 0x15e   : > { %s866_s8 = smov 128   ;;  %s867_s27 = smov 8  }
 0x15f   : > { %603 = dma.vmem_to_hbm [thread:$0]  (%p1192_p2), %s1110_s6, 384, %s1115_s14, %s424_s16, %s866_s8, %s866_s8, %s867_s27  }
 0x160 PF: > { %s453_s7 = sand.u32 1, %s837_s18   ;;  %p1193_p3 = scmp.ne.s32.totalorder %s1182_s12, 0 }
 0x161   : > { %p1194_p4 = scmp.ge.s32.totalorder %s857_s23, 2  ;;  %s454_s24 = scalar_lea.sflag [#allocation4], %s453_s7 }
 0x163   : > { %p617_p5 = pnand %p1194_p4, %p1193_p3 }
 0x165   : > { %832 = dma.done.wait (!%p617_p5), %s454_s24, 384  }
 0x166   : > { %834 = vsyncadd (!%p617_p5), %s454_s24, 4294966912  ;;  %s22_s23 = sadd.s32 1, %s857_s23   ;;  %s1195_s9 = sld [smem:[#allocation13_spill]] }
 0x167   : > { %p19_p9 = scmp.ge.s32.totalorder %s22_s23, 4   ;;  %s1196_s18 = smov %s841_s19 }
 0x168   : > { %s1197_s19 = smov %s845_s20  ;;  %s1198_s20 = smov %s946_s30 }
 0x169   : > { %s1199_s21 = smov %s853_s22  ;;  %21 = sbr.rel (!%p19_p9) target bundleno = 9 (0x9), region = 103 }
 0x16c   : > { %s1200_s22 = smov %s1195_s9 }
 0x170   :  { %459 = vsyncpa [#allocation3], 1 }
 0x171   :  { %461 = vsyncpa [#allocation3 + $0x1], 1 }
 0x172   :  { %462 = vsyncpa [#allocation6], 1 }
 0x173   :  { %463 = vsyncpa [#allocation4], 1 }
 0x174   :  { %465 = vsyncpa [#allocation4 + $0x1], 1 }

</bundles_post_ra>
